<compile_context>
chip_gen: v7x
topology: tpu7x:2x2x1
jax: 0.10.0
libtpu: 0.0.40
codegen_flags: <defaults>
</compile_context>

<pallas_src>
import functools

import jax
import jax.numpy as jnp
from jax import lax
from jax.experimental import pallas as pl
from jax.experimental.pallas import tpu as pltpu


# dtype fed to the MXU and used for HBM-resident weights / activations;
# accumulation is always f32 and LayerNorm / softmax statistics are f32.
_MXU_DTYPE = jnp.bfloat16
_ACT_DTYPE = jnp.bfloat16
_VMEM_LIMIT = 48 * 1024 * 1024   # explicit budget (defaults: 16 MiB v5e / 32 MiB v6e+)


def _round_up(x, m):
    return ((x + m - 1) // m) * m


def _pick_tile(dim, target, align):
    """Largest tile <= target that divides dim and is a multiple of `align`;
    falls back to the full dimension (full-dim blocks are always legal)."""
    if dim <= target:
        return dim
    t = (target // align) * align
    while t >= align:
        if dim % t == 0:
            return t
        t -= align
    return dim


def _row_plan(M, target):
    """Pick a row tile and the padded row count it divides (avoids the
    full-M fallback blowing VMEM for awkward M)."""
    if M <= target:
        Mp = _round_up(M, 8)
        return Mp, Mp
    return target, _round_up(M, target)


def _pad_rows(x, Mp):
    M = x.shape[0]
    if Mp == M:
        return x
    return jnp.pad(x, ((0, Mp - M), (0, 0)))


# ----------------------------- Pallas kernels -----------------------------

def _linear_kernel(x_ref, w_ref, b_ref, o_ref, acc_ref, *, activation):
    @pl.when(pl.program_id(2) == 0)
    def _():
        acc_ref[...] = jnp.zeros_like(acc_ref)

    acc_ref[...] += jnp.dot(x_ref[...].astype(_MXU_DTYPE),
                            w_ref[...].astype(_MXU_DTYPE),
                            preferred_element_type=jnp.float32)

    @pl.when(pl.program_id(2) == pl.num_programs(2) - 1)
    def _():
        y = acc_ref[...] + b_ref[...].astype(jnp.float32)
        if activation == "relu":
            y = jnp.maximum(y, 0.0)
        o_ref[...] = y.astype(o_ref.dtype)


def linear(x, w, b, activation=None, *, tm=256, tn=256, tk=512):
    """o = act(x @ w + b); x:(M,K) w:(K,N) b:(N,) -> (M,N) in bf16."""
    M, K = x.shape
    _, N = w.shape
    tm, Mp = _row_plan(M, tm)
    x = _pad_rows(x, Mp)
    tn = _pick_tile(N, tn, 128)
    tk = _pick_tile(K, tk, 128)
    grid = (Mp // tm, N // tn, K // tk)
    out = pl.pallas_call(
        functools.partial(_linear_kernel, activation=activation),
        out_shape=jax.ShapeDtypeStruct((Mp, N), _ACT_DTYPE),
        grid_spec=pltpu.PrefetchScalarGridSpec(
            num_scalar_prefetch=0,
            grid=grid,
            in_specs=[pl.BlockSpec((tm, tk), lambda i, j, k: (i, k)),
                      pl.BlockSpec((tk, tn), lambda i, j, k: (k, j)),
                      pl.BlockSpec((1, tn), lambda i, j, k: (0, j))],
            out_specs=pl.BlockSpec((tm, tn), lambda i, j, k: (i, j)),
            scratch_shapes=[pltpu.VMEM((tm, tn), jnp.float32)]),
        compiler_params=pltpu.CompilerParams(
            dimension_semantics=("parallel", "parallel", "arbitrary"),
            vmem_limit_bytes=_VMEM_LIMIT),
    )(x, w, b.reshape(1, N))
    return out[:M] if Mp != M else out


def _linear_add_ln_kernel(x_ref, w_ref, b_ref, r_ref, g_ref, bt_ref, o_ref,
                          acc_ref, *, eps):
    @pl.when(pl.program_id(1) == 0)
    def _():
        acc_ref[...] = jnp.zeros_like(acc_ref)

    acc_ref[...] += jnp.dot(x_ref[...].astype(_MXU_DTYPE),
                            w_ref[...].astype(_MXU_DTYPE),
                            preferred_element_type=jnp.float32)

    @pl.when(pl.program_id(1) == pl.num_programs(1) - 1)
    def _():
        h = (acc_ref[...] + b_ref[...].astype(jnp.float32)
             + r_ref[...].astype(jnp.float32))
        mu = jnp.mean(h, axis=-1, keepdims=True)
        var = jnp.mean(jnp.square(h - mu), axis=-1, keepdims=True)
        y = (h - mu) * lax.rsqrt(var + eps)
        o_ref[...] = (y * g_ref[...].astype(jnp.float32)
                      + bt_ref[...].astype(jnp.float32)).astype(o_ref.dtype)


def linear_add_layernorm(x, w, b, res, gamma, beta, *, eps=1e-5, tm=256, tk=512):
    """LayerNorm(res + x @ w + b) fused in one kernel; LN reduction spans the
    full feature dim N inside one tile, rows + contraction are pipelined."""
    M, K = x.shape
    _, N = w.shape
    tm, Mp = _row_plan(M, tm)
    x = _pad_rows(x, Mp)
    res = _pad_rows(res, Mp)
    tk = _pick_tile(K, tk, 128)
    grid = (Mp // tm, K // tk)
    out = pl.pallas_call(
        functools.partial(_linear_add_ln_kernel, eps=eps),
        out_shape=jax.ShapeDtypeStruct((Mp, N), _ACT_DTYPE),
        grid_spec=pltpu.PrefetchScalarGridSpec(
            num_scalar_prefetch=0,
            grid=grid,
            in_specs=[pl.BlockSpec((tm, tk), lambda i, k: (i, k)),
                      pl.BlockSpec((tk, N), lambda i, k: (k, 0)),
                      pl.BlockSpec((1, N), lambda i, k: (0, 0)),
                      pl.BlockSpec((tm, N), lambda i, k: (i, 0)),
                      pl.BlockSpec((1, N), lambda i, k: (0, 0)),
                      pl.BlockSpec((1, N), lambda i, k: (0, 0))],
            out_specs=pl.BlockSpec((tm, N), lambda i, k: (i, 0)),
            scratch_shapes=[pltpu.VMEM((tm, N), jnp.float32)]),
        compiler_params=pltpu.CompilerParams(
            dimension_semantics=("parallel", "arbitrary"),
            vmem_limit_bytes=_VMEM_LIMIT),
    )(x, w, b.reshape(1, N), res, gamma.reshape(1, N), beta.reshape(1, N))
    return out[:M] if Mp != M else out


def _ffn_ln_kernel(x_ref, w1_ref, b1_ref, w2_ref, b2_ref, r_ref, g_ref, bt_ref,
                   o_ref, acc_ref, *, eps):
    """LayerNorm(res + relu(x @ w1 + b1) @ w2 + b2) with d_ff as the grid
    contraction axis; the (tm, d_ff) intermediate never leaves VMEM."""
    f = pl.program_id(1)

    @pl.when(f == 0)
    def _():
        acc_ref[...] = jnp.zeros_like(acc_ref)

    h1 = jnp.dot(x_ref[...].astype(_MXU_DTYPE), w1_ref[...].astype(_MXU_DTYPE),
                 preferred_element_type=jnp.float32)
    h1 = jnp.maximum(h1 + b1_ref[...].astype(jnp.float32), 0.0)
    acc_ref[...] += jnp.dot(h1.astype(_MXU_DTYPE), w2_ref[...].astype(_MXU_DTYPE),
                            preferred_element_type=jnp.float32)

    @pl.when(f == pl.num_programs(1) - 1)
    def _():
        h = (acc_ref[...] + b2_ref[...].astype(jnp.float32)
             + r_ref[...].astype(jnp.float32))
        mu = jnp.mean(h, axis=-1, keepdims=True)
        var = jnp.mean(jnp.square(h - mu), axis=-1, keepdims=True)
        y = (h - mu) * lax.rsqrt(var + eps)
        o_ref[...] = (y * g_ref[...].astype(jnp.float32)
                      + bt_ref[...].astype(jnp.float32)).astype(o_ref.dtype)


def ffn_add_layernorm(x, w1, b1, w2, b2, res, gamma, beta, *, eps=1e-5,
                      tm=256, tf=512):
    M, D = x.shape
    F = w1.shape[1]
    N = w2.shape[1]
    tm, Mp = _row_plan(M, tm)
    x = _pad_rows(x, Mp)
    res = _pad_rows(res, Mp)
    tf = _pick_tile(F, tf, 128)
    grid = (Mp // tm, F // tf)
    out = pl.pallas_call(
        functools.partial(_ffn_ln_kernel, eps=eps),
        out_shape=jax.ShapeDtypeStruct((Mp, N), _ACT_DTYPE),
        grid_spec=pltpu.PrefetchScalarGridSpec(
            num_scalar_prefetch=0,
            grid=grid,
            in_specs=[pl.BlockSpec((tm, D), lambda i, f: (i, 0)),
                      pl.BlockSpec((D, tf), lambda i, f: (0, f)),
                      pl.BlockSpec((1, tf), lambda i, f: (0, f)),
                      pl.BlockSpec((tf, N), lambda i, f: (f, 0)),
                      pl.BlockSpec((1, N), lambda i, f: (0, 0)),
                      pl.BlockSpec((tm, N), lambda i, f: (i, 0)),
                      pl.BlockSpec((1, N), lambda i, f: (0, 0)),
                      pl.BlockSpec((1, N), lambda i, f: (0, 0))],
            out_specs=pl.BlockSpec((tm, N), lambda i, f: (i, 0)),
            scratch_shapes=[pltpu.VMEM((tm, N), jnp.float32)]),
        compiler_params=pltpu.CompilerParams(
            dimension_semantics=("parallel", "arbitrary"),
            vmem_limit_bytes=_VMEM_LIMIT),
    )(x, w1, b1.reshape(1, F), w2, b2.reshape(1, N), res,
      gamma.reshape(1, N), beta.reshape(1, N))
    return out[:M] if Mp != M else out


def _qkv_attn_kernel(h_ref, w_ref, b_ref, o_ref, qkv_acc, *, n_heads, d_model,
                     scale):
    """Fused QKV projection + multi-head self-attention for one batch element.
    grid axis 1 tiles the d_model contraction of h @ w_qkv; the (S, 3D) QKV
    tile stays in VMEM and attention runs in the finalize phase."""
    k = pl.program_id(1)

    @pl.when(k == 0)
    def _():
        qkv_acc[...] = jnp.zeros_like(qkv_acc)

    qkv_acc[...] += jnp.dot(h_ref[0].astype(_MXU_DTYPE),
                            w_ref[...].astype(_MXU_DTYPE),
                            preferred_element_type=jnp.float32)

    @pl.when(k == pl.num_programs(1) - 1)
    def _():
        qkv = qkv_acc[...] + b_ref[...].astype(jnp.float32)   # (S, 3D) f32
        dk = d_model // n_heads
        outs = []
        # TODO(synk): for long S switch to a flash-style online softmax over KV
        # blocks, and batch heads into one MXU call for better 256-wide fill.
        for hh in range(n_heads):          # static head loop on the VMEM tile
            q = (qkv[:, hh * dk:(hh + 1) * dk] * scale).astype(_MXU_DTYPE)
            kk = qkv[:, d_model + hh * dk:d_model + (hh + 1) * dk].astype(_MXU_DTYPE)
            v = qkv[:, 2 * d_model + hh * dk:2 * d_model + (hh + 1) * dk].astype(_MXU_DTYPE)
            # q @ k^T via dot_general (contract dk on both sides, bf16 feeds)
            s = lax.dot_general(q, kk, (((1,), (1,)), ((), ())),
                                preferred_element_type=jnp.float32)
            m = jnp.max(s, axis=-1, keepdims=True)
            p = jnp.exp(s - m)
            l = jnp.sum(p, axis=-1, keepdims=True)
            o_h = jnp.dot(p.astype(_MXU_DTYPE), v,
                          preferred_element_type=jnp.float32)
            # reciprocal applied to the (S, dk) output, not the (S, S) probs
            outs.append(o_h * pl.reciprocal(l, approx=True))
        # Single lane-dense (S, D) store instead of n_heads partial stores.
        o_ref[0] = jnp.concatenate(outs, axis=-1).astype(o_ref.dtype)


def qkv_attention(h, w_qkv, b_qkv, n_heads, *, tk=256):
    """h: (B, S, D) bf16; returns (B, S, D) bf16 attention output.  QKV
    projection is fused in-kernel (no (M, 3D) HBM round trip)."""
    B, S, D = h.shape
    threeD = w_qkv.shape[1]
    dk = D // n_heads
    scale = 1.0 / float(dk) ** 0.5
    tk = _pick_tile(D, tk, 128)
    grid = (B, D // tk)
    return pl.pallas_call(
        functools.partial(_qkv_attn_kernel, n_heads=n_heads, d_model=D,
                          scale=scale),
        out_shape=jax.ShapeDtypeStruct((B, S, D), _ACT_DTYPE),
        grid_spec=pltpu.PrefetchScalarGridSpec(
            num_scalar_prefetch=0,
            grid=grid,
            in_specs=[pl.BlockSpec((1, S, tk), lambda b, k: (b, 0, k)),
                      pl.BlockSpec((tk, threeD), lambda b, k: (k, 0)),
                      pl.BlockSpec((1, threeD), lambda b, k: (0, 0))],
            out_specs=pl.BlockSpec((1, S, D), lambda b, k: (b, 0, 0)),
            scratch_shapes=[pltpu.VMEM((S, threeD), jnp.float32)]),
        compiler_params=pltpu.CompilerParams(
            dimension_semantics=("parallel", "arbitrary"),
            vmem_limit_bytes=_VMEM_LIMIT),
    )(h, w_qkv, b_qkv.reshape(1, threeD))


# ----------------------------- parameter init -----------------------------

def init_params(key, n_vocab, n_blocks, n_heads, embedding_size, d_model, d_ff,
                max_seq_len):
    n_keys = 4 + n_blocks * 4
    keys = iter(jax.random.split(key, n_keys))

    def dense(fan_in, fan_out):
        w = 0.02 * jax.random.normal(next(keys), (fan_in, fan_out), jnp.float32)
        return w.astype(_ACT_DTYPE)

    def emb(rows, cols):
        e = 0.02 * jax.random.normal(next(keys), (rows, cols), jnp.float32)
        return e.astype(_ACT_DTYPE)

    p = {
        "tok_emb": emb(n_vocab, embedding_size),
        "pos_emb": emb(max_seq_len, embedding_size),
        "seg_emb": emb(2, embedding_size),
        "emb_hidden_w": dense(embedding_size, d_model),
        "emb_hidden_b": jnp.zeros((d_model,), _ACT_DTYPE),
        "blocks": [],
    }
    for _ in range(n_blocks):
        blk = {
            # fused Q|K|V projection
            "w_qkv": dense(d_model, 3 * d_model),
            "b_qkv": jnp.zeros((3 * d_model,), _ACT_DTYPE),
            "wo": dense(d_model, d_model),
            "bo": jnp.zeros((d_model,), _ACT_DTYPE),
            "ln1_g": jnp.ones((d_model,), _ACT_DTYPE),
            "ln1_b": jnp.zeros((d_model,), _ACT_DTYPE),
            "w1": dense(d_model, d_ff),
            "b1": jnp.zeros((d_ff,), _ACT_DTYPE),
            "w2": dense(d_ff, d_model),
            "b2": jnp.zeros((d_model,), _ACT_DTYPE),
            "ln2_g": jnp.ones((d_model,), _ACT_DTYPE),
            "ln2_b": jnp.zeros((d_model,), _ACT_DTYPE),
        }
        p["blocks"].append(blk)
    return p


# ----------------------------- forward pass -----------------------------

def albert_forward(params, inputs, segments=None, *, n_heads):
    B, S = inputs.shape
    # TransformerEmbedding: token + positional (+ segment) embeddings.
    # Gather is glue (vocab lookup has no rectangular BlockSpec form).
    x = jnp.take(params["tok_emb"], inputs, axis=0)
    x = x + params["pos_emb"][:S][None, :, :]
    if segments is not None:
        x = x + jnp.take(params["seg_emb"], segments, axis=0)
    x = x.astype(_ACT_DTYPE)
    # TODO(synk): dropout omitted (inference mode => identity).

    E = x.shape[-1]
    D = params["emb_hidden_w"].shape[1]

    # embedding_hidden_fc: (B*S, E) @ (E, D)
    h = linear(x.reshape(B * S, E), params["emb_hidden_w"], params["emb_hidden_b"])

    for blk in params["blocks"]:
        # ---- multi-head self-attention sublayer (post-LN) ----
        attn = qkv_attention(h.reshape(B, S, D), blk["w_qkv"], blk["b_qkv"],
                             n_heads=n_heads)                    # (B, S, D)
        # output projection fused with residual add + LayerNorm
        h = linear_add_layernorm(attn.reshape(B * S, D), blk["wo"], blk["bo"],
                                 h, blk["ln1_g"], blk["ln1_b"])

        # ---- feed-forward sublayer (post-LN), fully fused ----
        h = ffn_add_layernorm(h, blk["w1"], blk["b1"], blk["w2"], blk["b2"],
                              h, blk["ln2_g"], blk["ln2_b"])

    return h.reshape(B, S, D)


# ----------------------------- main -----------------------------

if __name__ == "__main__":
    # Small, forward-consistent shapes.
    n_vocab = 100
    n_blocks = 2
    n_heads = 4
    embedding_size = 32
    d_model = 64
    d_ff = 128
    max_seq_len = 16
    B, S = 2, 8

    key = jax.random.PRNGKey(0)
    pkey, ikey, skey = jax.random.split(key, 3)

    params = init_params(pkey, n_vocab, n_blocks, n_heads, embedding_size,
                         d_model, d_ff, max_seq_len)
    inputs = jax.random.randint(ikey, (B, S), 0, n_vocab, dtype=jnp.int32)
    segments = jax.random.randint(skey, (B, S), 0, 2, dtype=jnp.int32)

    out = albert_forward(params, inputs, segments, n_heads=n_heads)
    out = jax.block_until_ready(out)

    assert out.shape == (B, S, d_model), out.shape
    assert jnp.all(jnp.isfinite(out.astype(jnp.float32)))
    print("KERNEL_OK")
</pallas_src>

<mosaic_0001>
module attributes {stable_mosaic.version = 11 : i64} {
  func.func @_linear_kernel(%arg0: i32, %arg1: i32, %arg2: i32, %arg3: memref<16x32xbf16, #tpu.memory_space<vmem>>, %arg4: memref<32x64xbf16, #tpu.memory_space<vmem>>, %arg5: memref<1x64xbf16, #tpu.memory_space<vmem>>, %arg6: memref<16x64xbf16, #tpu.memory_space<vmem>>, %arg7: memref<16x64xf32, #tpu.memory_space<vmem>>) attributes {dimension_semantics = [#tpu.dimension_semantics<parallel>, #tpu.dimension_semantics<parallel>, #tpu.dimension_semantics<arbitrary>], iteration_bounds = array<i64: 1, 1, 1>, scalar_prefetch = 0 : i64, scratch_operands = 1 : i64, tpu.core_type = #tpu.core_type<tc>, window_params = [{transform_indices = @transform_0, window_bounds = array<i64: 16, 32>}, {transform_indices = @transform_1, window_bounds = array<i64: 32, 64>}, {transform_indices = @transform_2, window_bounds = array<i64: 1, 64>}, {transform_indices = @transform_3, window_bounds = array<i64: 16, 64>}]} {
    %c0_i32 = arith.constant 0 : i32
    %0 = arith.cmpi eq, %arg2, %c0_i32 : i32
    %1 = arith.extui %0 : i1 to i32
    %c0_i32_0 = arith.constant 0 : i32
    %2 = arith.cmpi ne, %1, %c0_i32_0 : i32
    scf.if %2 {
      %cst_10 = arith.constant 0.000000e+00 : f32
      %12 = vector.broadcast %cst_10 : f32 to vector<16x64xf32>
      %c0_11 = arith.constant 0 : index
      %c0_12 = arith.constant 0 : index
      %13 = vector.load %arg7[%c0_11, %c0_12] : memref<16x64xf32, #tpu.memory_space<vmem>>, vector<16x64xf32>
      tpu.vector_store %arg7[%c0_11, %c0_12], %12 {strides = array<i32>} : memref<16x64xf32, #tpu.memory_space<vmem>>, vector<16x64xf32>,
    } else {
    }
    %c0 = arith.constant 0 : index
    %c0_1 = arith.constant 0 : index
    %3 = vector.load %arg7[%c0, %c0_1] : memref<16x64xf32, #tpu.memory_space<vmem>>, vector<16x64xf32>
    %c0_2 = arith.constant 0 : index
    %c0_3 = arith.constant 0 : index
    %4 = vector.load %arg3[%c0_2, %c0_3] : memref<16x32xbf16, #tpu.memory_space<vmem>>, vector<16x32xbf16>
    %c0_4 = arith.constant 0 : index
    %c0_5 = arith.constant 0 : index
    %5 = vector.load %arg4[%c0_4, %c0_5] : memref<32x64xbf16, #tpu.memory_space<vmem>>, vector<32x64xbf16>
    %cst = arith.constant dense<0.000000e+00> : vector<16x64xf32>
    %6 = tpu.matmul %4, %5, %cst {dimension_numbers = #tpu.dot_dimension_numbers<[1], [0], [0], [1], [0, 0, 1, 1], [], []>} : vector<16x32xbf16>, vector<32x64xbf16>, vector<16x64xf32> -> vector<16x64xf32>
    %7 = arith.addf %3, %6 : vector<16x64xf32>
    %c0_6 = arith.constant 0 : index
    %c0_7 = arith.constant 0 : index
    %8 = vector.load %arg7[%c0_6, %c0_7] : memref<16x64xf32, #tpu.memory_space<vmem>>, vector<16x64xf32>
    tpu.vector_store %arg7[%c0_6, %c0_7], %7 {strides = array<i32>} : memref<16x64xf32, #tpu.memory_space<vmem>>, vector<16x64xf32>,
    %c0_i32_8 = arith.constant 0 : i32
    %9 = arith.cmpi eq, %arg2, %c0_i32_8 : i32
    %10 = arith.extui %9 : i1 to i32
    %c0_i32_9 = arith.constant 0 : i32
    %11 = arith.cmpi ne, %10, %c0_i32_9 : i32
    scf.if %11 {
      %c0_10 = arith.constant 0 : index
      %c0_11 = arith.constant 0 : index
      %12 = vector.load %arg7[%c0_10, %c0_11] : memref<16x64xf32, #tpu.memory_space<vmem>>, vector<16x64xf32>
      %c0_12 = arith.constant 0 : index
      %c0_13 = arith.constant 0 : index
      %13 = vector.load %arg5[%c0_12, %c0_13] : memref<1x64xbf16, #tpu.memory_space<vmem>>, vector<1x64xbf16>
      %14 = arith.extf %13 : vector<1x64xbf16> to vector<1x64xf32>
      %15 = vector.broadcast %14 : vector<1x64xf32> to vector<16x64xf32>
      %16 = arith.addf %12, %15 : vector<16x64xf32>
      %17 = arith.truncf %16 : vector<16x64xf32> to vector<16x64xbf16>
      %c0_14 = arith.constant 0 : index
      %c0_15 = arith.constant 0 : index
      %18 = vector.load %arg6[%c0_14, %c0_15] : memref<16x64xbf16, #tpu.memory_space<vmem>>, vector<16x64xbf16>
      tpu.vector_store %arg6[%c0_14, %c0_15], %17 {strides = array<i32>} : memref<16x64xbf16, #tpu.memory_space<vmem>>, vector<16x64xbf16>,
    } else {
    }
    return
  }
  func.func @transform_0(%arg0: i32, %arg1: i32, %arg2: i32) -> (i32, i32) {
    %c0_i32 = arith.constant 0 : i32
    return %arg0, %arg2 : i32, i32
  }
  func.func @transform_1(%arg0: i32, %arg1: i32, %arg2: i32) -> (i32, i32) {
    %c0_i32 = arith.constant 0 : i32
    return %arg2, %arg1 : i32, i32
  }
  func.func @transform_2(%arg0: i32, %arg1: i32, %arg2: i32) -> (i32, i32) {
    %c0_i32 = arith.constant 0 : i32
    %c0_i32_0 = arith.constant 0 : i32
    return %c0_i32, %arg1 : i32, i32
  }
  func.func @transform_3(%arg0: i32, %arg1: i32, %arg2: i32) -> (i32, i32) {
    %c0_i32 = arith.constant 0 : i32
    return %arg0, %arg1 : i32, i32
  }
}

</mosaic_0001>

<bundles_post_ra>
// kernel: tpu_custom_call.1
= control target key start
LH: loop header
LB: loop body
LE: loop exit
PB: predicated region body
PF: predicated region fallthrough
CT: control target
= control target key end

     0   :  { %8 = vsyncpa [#allocation4], 0  ;;  %s348_s0 = inlined_call_operand.hbm [shape: bf16[16,32], index: 0, kind: input, shape index: {}]   ;;  %s349_s1 = inlined_call_operand.hbm [shape: bf16[32,64], index: 1, kind: input, shape index: {}]   ;;  %s350_s2 = inlined_call_operand.vmem [shape: bf16[1,64], index: 2, kind: input, shape index: {}]   ;;  %s351_s3 = inlined_call_operand.hbm [shape: bf16[16,64], index: 3, kind: output, shape index: {}]  }
   0x1   :  { %9 = vsyncpa [#allocation7], 0 }
   0x2   :  { %10 = vsyncpa [#allocation5], 0  ;;  %s269_s12 = smov [#allocation3]   ;;  %s197_s16 = scalar_lea.hbm %s348_s0, 128 }
   0x3   :  { %s16_s13 = sshll.u32 %s269_s12, 4  ;;  %p198_p0 = scmp.ne.s32.totalorder %s348_s0, %s197_s16  ;;  %s17_s13 = int_to_ptr.vmem [resolvable:$true] %s16_s13 }
   0x4   :  { %p201_p1 = scmp.lt.u32.totalorder %s197_s16, %s348_s0 }
   0x6   :  { %p203_p2 = pnand %p201_p1, %p198_p0 }
   0x8   :  { %206 = shalt.err (!%p203_p2)
}
   0x9   :  { %s207_s21 = scalar_lea.vmem %s17_s13, 128  ;;  %p212_p4 = scmp.lt.s32.totalorder %s17_s13, %s17_s13 }
   0xa   :  { %p208_p3 = scmp.ne.s32.totalorder %s17_s13, %s207_s21  ;;  %p213_p5 = scmp.lt.s32.totalorder %s207_s21, %s207_s21 }
   0xc   :  { %p214_p6 = por %p213_p5, %p212_p4 }
   0xe   :  { %p215_p7 = pnand %p214_p6, %p208_p3 }
  0x10   :  { %218 = shalt.err (!%p215_p7)
}
  0x11   :  { %s270_s22 = smov 64   ;;  %s271_s23 = smov 4  }
  0x12   :  { %22 = dma.hbm_to_vmem [thread:$0]  %s348_s0, 128, %s17_s13, [#allocation4], %s270_s22, %s270_s22, %s271_s23  }
  0x13   :  { %s272_s26 = smov [#allocation6]   ;;  %s219_s30 = scalar_lea.hbm %s349_s1, 256 }
  0x14   :  { %s28_s27 = sshll.u32 %s272_s26, 4  ;;  %p220_p8 = scmp.ne.s32.totalorder %s349_s1, %s219_s30  ;;  %s29_s27 = int_to_ptr.vmem [resolvable:$true] %s28_s27 }
  0x15   :  { %p223_p9 = scmp.lt.u32.totalorder %s219_s30, %s349_s1 }
  0x17   :  { %p225_p10 = pnand %p223_p9, %p220_p8 }
  0x19   :  { %228 = shalt.err (!%p225_p10)
}
  0x1a   :  { %s229_s8 = scalar_lea.vmem %s29_s27, 256  ;;  %p234_p12 = scmp.lt.s32.totalorder %s29_s27, %s29_s27 }
  0x1b   :  { %p230_p11 = scmp.ne.s32.totalorder %s29_s27, %s229_s8  ;;  %p235_p13 = scmp.lt.s32.totalorder %s229_s8, %s229_s8 }
  0x1d   :  { %p236_p0 = por %p235_p13, %p234_p12 }
  0x1f   :  { %p237_p1 = pnand %p236_p0, %p230_p11 }
  0x21   :  { %240 = shalt.err (!%p237_p1)
}
  0x22   :  { %34 = dma.hbm_to_vmem [thread:$0]  %s349_s1, 256, %s29_s27, [#allocation7], %s270_s22, %s270_s22, %s271_s23  }
  0x23   :  { %263 = dma.done.wait [#allocation4], 128  }
  0x24   :  { %264 = vsyncadd [#allocation4], 4294967168 }
  0x25   :  { %265 = dma.done.wait [#allocation7], 256  }
  0x26   :  { %266 = vsyncadd [#allocation7], 4294967040  ;;  %vm48_vm0 = vcmask 523264   ;;  %v273_v0 = vmov 0.0   ;;  %vm274_vm1 = vmmov 0   ;;  %v194_v1 = vld [vmem:[#allocation6] sm:$0xff]   ;;  %v133_v4 = vlaneseq }
  0x27   :  { %49 = vst.msk [vmem:[#allocation2] sm:$0xff] %vm48_vm0, %v273_v0  ;;  %50 = vst.msk [vmem:[#allocation2 + $0x8] sm:$0xff] %vm48_vm0, %v273_v0  ;;  %179 = vmatprep.subr.bf16.mxu0 %v273_v0  ;;  %183 = vmatprep.mubr.msk.bf16.mxu0 %vm274_vm1, %v273_v0  ;;  %v195_v2 = vld [vmem:[#allocation6 + $0x8] sm:$0xff]   ;;  %v196_v3 = vld [vmem:[#allocation3] sm:$0xff]   ;;  %vm76_vm2 = vcmask 261120   ;;  %vm147_vm3 = vcmask 519168  }
  0x28   :  { %180 = vmatpush3.bf16.msra.mxu0 %v194_v1  ;;  %v134_v6 = vshrl.u32 %v133_v4, 7  ;;  %v131_v9 = vld [vmem:[%s350_s2] sm:$0x1]  ;;  %s275_s11 = smov [#allocation8]  }
  0x29   :  { %181 = vmatprep.subr.bf16.mxu0 %v273_v0  ;;  %v132_v15 = vunpack.c.l.bf16 %v131_v9  ;;  %s155_s12 = sshll.u32 %s275_s11, 4  ;;  %s156_s12 = int_to_ptr.vmem [resolvable:$true] %s155_s12 }
  0x2a   :  { %v135_v16 = vsub.s32 0, %v134_v6  ;;  %s241_s2 = scalar_lea.vmem %s156_s12, 128  ;;  %p246_p3 = scmp.lt.s32.totalorder %s156_s12, %s156_s12 }
  0x2b   :  { %p242_p2 = scmp.ne.s32.totalorder %s156_s12, %s241_s2  ;;  %p247_p4 = scmp.lt.s32.totalorder %s241_s2, %s241_s2 }
  0x2c   :  { %182 = vmatpush3.bf16.msra.mxu0 %v195_v2  ;;  %v136_v17 = vrot.slane %v132_v15, %v135_v16 }
  0x2d   :  { %p248_p5 = por %p247_p4, %p246_p3 }
  0x2e   :  { %v51_v5 = vld [vmem:[#allocation2] sm:$0xff]  ;;  %v52_v8 = vld [vmem:[#allocation2 + $0x8] sm:$0xff] }
  0x2f   :  { %184 = vmatmul.mubr.msk.bf16.vlgmr.msra.gmra.mrb[0].mxu0 %vm76_vm2, %v196_v3  ;;  %p249_p6 = pnand %p248_p5, %p242_p2 }
 0x102   :  { %v114_v7 = vpop.f32.mrb[0].mxu0 }
 0x103   :  { %v121_v10 = vadd.f32 %v114_v7, %v51_v5  ;;  %v185_v11 = vpop.f32.mrb[1].mxu0 }
 0x104   :  { %v117_v12 = vpop.f32.mrb[2].mxu0 }
 0x105   :  { %124 = vst.msk [vmem:[#allocation2] sm:$0xff] %vm48_vm0, %v121_v10  ;;  %v122_v13 = vadd.f32 %v117_v12, %v52_v8  ;;  %v186_v14 = vpop.f32.mrb[3].mxu0 }
 0x107   :  { %125 = vst.msk [vmem:[#allocation2 + $0x8] sm:$0xff] %vm48_vm0, %v122_v13 }
 0x10c   :  { %v129_v18 = vld [vmem:[#allocation2] sm:$0xff] }
 0x10d   :  { %v137_v19 = vadd.f32 %v136_v17, %v129_v18 }
 0x10e   :  { %v130_v20 = vld [vmem:[#allocation2 + $0x8] sm:$0xff] }
 0x10f   :  { %v138_v21 = vadd.f32 %v136_v17, %v130_v20  ;;  %v174_v22 = vpack.c.bf16 %v137_v19, %v137_v19 }
 0x111   :  { %v175_v23 = vpack.c.bf16 %v138_v21, %v138_v21  ;;  %148 = vst.msk [vmem:[#allocation8] sm:$0xf] %vm147_vm3, %v174_v22 }
 0x113   :  { %149 = vst.msk [vmem:[#allocation8 + $0x4] sm:$0xf] %vm147_vm3, %v175_v23 }
 0x114   :  { %252 = shalt.err (!%p249_p6)
}
 0x115   :  { %s253_s15 = scalar_lea.hbm %s351_s3, 128 }
 0x116   :  { %p254_p7 = scmp.ne.s32.totalorder %s351_s3, %s253_s15  ;;  %p257_p8 = scmp.lt.u32.totalorder %s253_s15, %s351_s3 }
 0x118   :  { %p259_p9 = pnand %p257_p8, %p254_p7 }
 0x11a   :  { %262 = shalt.err (!%p259_p9)
}
 0x11b   :  { %161 = dma.vmem_to_hbm [thread:$0]  %s156_s12, 128, %s351_s3, [#allocation5], %s270_s22, %s270_s22, %s271_s23  }
 0x11c   :  { %267 = dma.done.wait [#allocation5], 128  }
 0x11d   :  { %268 = vsyncadd [#allocation5], 4294967168 }
 0x11e   :  { %165 = vsyncpa [#allocation4], 1 }
 0x11f   :  { %166 = vsyncpa [#allocation7], 1 }
 0x120   :  { %167 = vsyncpa [#allocation5], 1 }

</bundles_post_ra>
